<compile_context>
chip_gen: v7x
topology: tpu7x:2x2x1
jax: 0.10.0
libtpu: 0.0.40
codegen_flags: <defaults>
</compile_context>

<pallas_src>
import jax
import jax.numpy as jnp
from jax.experimental import pallas as pl
from jax.experimental.pallas import tpu as pltpu


def _mm(a, b):
    """(M, K) x (K, N) -> (M, N) matmul with f32 accumulation (MXU)."""
    return jax.lax.dot_general(a, b, (((1,), (0,)), ((), ())),
                               preferred_element_type=jnp.float32)


# --------------------------------------------------------------------------
# Kernel A: pointwise SharedMLP (1x1 conv + folded BN + LeakyReLU)
# --------------------------------------------------------------------------
def _make_pointwise_mlp_kernel(negative_slope):
    def kernel(x_ref, w_ref, b_ref, o_ref):
        y = _mm(w_ref[...].astype(jnp.float32), x_ref[0].astype(jnp.float32))
        y = y + b_ref[...].astype(jnp.float32)
        if negative_slope is not None:
            y = jnp.where(y > 0, y, negative_slope * y)
        o_ref[0] = y.astype(o_ref.dtype)
    return kernel


def _pointwise_mlp(x, w, b, negative_slope, tq):
    """x: (B, C_in, N_pad) -> (B, C_out, N_pad)."""
    B, c_in, n_pad = x.shape
    c_out = w.shape[0]
    nt = n_pad // tq
    return pl.pallas_call(
        _make_pointwise_mlp_kernel(negative_slope),
        out_shape=jax.ShapeDtypeStruct((B, c_out, n_pad), jnp.float32),
        grid_spec=pltpu.PrefetchScalarGridSpec(
            num_scalar_prefetch=0, grid=(B, nt),
            in_specs=[
                pl.BlockSpec((1, c_in, tq), lambda b, q: (b, 0, q)),
                pl.BlockSpec((c_out, c_in), lambda b, q: (0, 0)),
                pl.BlockSpec((c_out, 1), lambda b, q: (0, 0)),
            ],
            out_specs=pl.BlockSpec((1, c_out, tq), lambda b, q: (b, 0, q))),
        compiler_params=pltpu.CompilerParams(
            dimension_semantics=("parallel", "parallel"),
            vmem_limit_bytes=32 * 1024 * 1024),
    )(x, w, b)


# --------------------------------------------------------------------------
# Kernel B: KNN + relative position encoding + mlp_rpe1 + PFA + attentive pool 1
# --------------------------------------------------------------------------
def _make_knn_agg1_kernel(K, TQ, n_pad, C1, n_out):
    def kernel(xyz_c_ref, gsrc_ref, w_rpe1_ref, b_rpe1_ref,
               ws1_ref, wp1_ref, bp1_ref,
               pooled1_ref, rpe1_out_ref, idx_out_ref):
        q_off = pl.multiple_of(pl.program_id(1) * TQ, TQ)

        xyz_c = xyz_c_ref[0].astype(jnp.float32)            # (n_pad, 3) support coords
        gsrc = gsrc_ref[0].astype(jnp.float32)              # (3+C1, n_pad) gather source
        q_cols = gsrc_ref[0, :, pl.ds(q_off, TQ)].astype(jnp.float32)  # (3+C1, TQ)
        q_xyz = q_cols[:3, :]                               # (3, TQ) query-tile coords

        # ---- pairwise squared distances: support on sublanes, query on lanes
        dist_sq = jnp.zeros((n_pad, TQ), jnp.float32)
        for d in range(3):
            diff = xyz_c[:, d:d + 1] - q_xyz[d:d + 1, :]    # (n_pad, TQ)
            dist_sq = dist_sq + diff * diff

        iota_n = jax.lax.broadcasted_iota(jnp.int32, (n_pad, TQ), 0)
        inf = jnp.float32(jnp.inf)

        # ---- iterative K-nearest selection (argmin = sublane reduction);
        #      one-hot selectors drive MXU gathers of coords + mlp1 features.
        d_work = dist_sq
        g_list, idx_list, dist_list = [], [], []
        for _ in range(K):
            min_d = jnp.min(d_work, axis=0, keepdims=True)                  # (1, TQ)
            idx = jnp.min(jnp.where(d_work == min_d, iota_n, n_pad),
                          axis=0, keepdims=True)                            # (1, TQ)
            mask = iota_n == idx                                            # reused
            onehot = mask.astype(jnp.float32)
            g_list.append(_mm(gsrc, onehot))                                # (3+C1, TQ)
            idx_list.append(idx)
            dist_list.append(min_d)
            d_work = jnp.where(mask, inf, d_work)

        gathered = jnp.concatenate(g_list, axis=1)           # (3+C1, K*TQ)
        nbr_xyz = gathered[:3, :]                            # (3,  K*TQ)
        nbr_feat = gathered[3:, :]                           # (C1, K*TQ)
        idx_all = jnp.concatenate(idx_list, axis=1)          # (1,  K*TQ) int32
        dist_all = jnp.sqrt(jnp.concatenate(dist_list, axis=1))
        q_tiled = jnp.concatenate([q_xyz] * K, axis=1)       # (3,  K*TQ)

        # ---- relative position encoding + mlp_rpe1 (all K batched on lanes)
        rpe = jnp.concatenate(
            [q_tiled, nbr_xyz, q_tiled - nbr_xyz, dist_all], axis=0)   # (10, K*TQ)
        rpe1 = jnp.maximum(
            _mm(w_rpe1_ref[...].astype(jnp.float32), rpe)
            + b_rpe1_ref[...].astype(jnp.float32), 0.0)                # (C1, K*TQ)

        # ---- point feature augmentation: [rpe1 ; gathered mlp1 features]
        feat_aug = jnp.concatenate([rpe1, nbr_feat], axis=0)           # (n_out, K*TQ)

        # ---- attentive pooling 1: per-channel softmax over the K lane blocks
        scores = _mm(ws1_ref[...].astype(jnp.float32), feat_aug)

        def ksl(x, k):
            return x[:, k * TQ:(k + 1) * TQ]

        m = ksl(scores, 0)
        for k in range(1, K):
            m = jnp.maximum(m, ksl(scores, k))
        s_sum = jnp.zeros((n_out, TQ), jnp.float32)
        acc = jnp.zeros((n_out, TQ), jnp.float32)
        for k in range(K):
            e = jnp.exp(ksl(scores, k) - m)
            s_sum = s_sum + e
            acc = acc + e * ksl(feat_aug, k)
        pooled = acc / s_sum                                            # (n_out, TQ)

        p1 = jnp.maximum(
            _mm(wp1_ref[...].astype(jnp.float32), pooled)
            + bp1_ref[...].astype(jnp.float32), 0.0)                    # (C1, TQ)

        pooled1_ref[0] = p1.astype(pooled1_ref.dtype)
        rpe1_out_ref[0] = rpe1.astype(rpe1_out_ref.dtype)
        idx_out_ref[0] = idx_all

    return kernel


# --------------------------------------------------------------------------
# Kernel C: mlp_rpe2 + PFA (pool-1 gather) + attentive pool 2 + mlp2 + shortcut
# --------------------------------------------------------------------------
def _make_agg2_kernel(K, TQ, n_pad, n_out):
    def kernel(rpe1_ref, idx_ref, pooled1_ref, featin_ref,
               w_rpe2_ref, b_rpe2_ref, ws2_ref, wp2_ref, bp2_ref,
               w_mlp2_ref, b_mlp2_ref, w_sc_ref, b_sc_ref, out_ref):
        rpe1 = rpe1_ref[0].astype(jnp.float32)               # (C1, K*TQ)
        idx_all = idx_ref[0]                                  # (1,  K*TQ) int32
        pooled1 = pooled1_ref[0].astype(jnp.float32)          # (C1, n_pad)

        # mlp_rpe2
        rpe2 = jnp.maximum(
            _mm(w_rpe2_ref[...].astype(jnp.float32), rpe1)
            + b_rpe2_ref[...].astype(jnp.float32), 0.0)       # (C1, K*TQ)

        # gather pooled phase-1 features at the stored neighbour indices
        # (one-hot rebuilt per neighbour to keep VMEM bounded by (n_pad, TQ))
        iota_n = jax.lax.broadcasted_iota(jnp.int32, (n_pad, TQ), 0)
        g_list = []
        for k in range(K):
            idx_k = idx_all[:, k * TQ:(k + 1) * TQ]           # (1, TQ)
            onehot = (iota_n == idx_k).astype(jnp.float32)    # (n_pad, TQ)
            g_list.append(_mm(pooled1, onehot))               # (C1, TQ)
        nbr_p1 = jnp.concatenate(g_list, axis=1)              # (C1, K*TQ)

        feat_aug = jnp.concatenate([rpe2, nbr_p1], axis=0)    # (n_out, K*TQ)

        # attentive pooling 2
        scores = _mm(ws2_ref[...].astype(jnp.float32), feat_aug)

        def ksl(x, k):
            return x[:, k * TQ:(k + 1) * TQ]

        m = ksl(scores, 0)
        for k in range(1, K):
            m = jnp.maximum(m, ksl(scores, k))
        s_sum = jnp.zeros((n_out, TQ), jnp.float32)
        acc = jnp.zeros((n_out, TQ), jnp.float32)
        for k in range(K):
            e = jnp.exp(ksl(scores, k) - m)
            s_sum = s_sum + e
            acc = acc + e * ksl(feat_aug, k)
        pooled = acc / s_sum                                   # (n_out, TQ)

        p2 = jnp.maximum(
            _mm(wp2_ref[...].astype(jnp.float32), pooled)
            + bp2_ref[...].astype(jnp.float32), 0.0)           # (n_out, TQ)

        # mlp2(features) + shortcut(input), then LeakyReLU (default slope 0.01)
        x_in = featin_ref[0].astype(jnp.float32)               # (n_in, TQ)
        y = (_mm(w_mlp2_ref[...].astype(jnp.float32), p2)
             + b_mlp2_ref[...].astype(jnp.float32)
             + _mm(w_sc_ref[...].astype(jnp.float32), x_in)
             + b_sc_ref[...].astype(jnp.float32))
        out_ref[0] = jnp.where(y > 0, y, 0.01 * y).astype(out_ref.dtype)

    return kernel


# --------------------------------------------------------------------------
# Wrapper: full LocalFeatureAggregation forward pass
# --------------------------------------------------------------------------
def local_feature_aggregation(xyz, features, params, n_neighbors, tq=128):
    """JAX/Pallas equivalent of LocalFeatureAggregation.forward (eval mode).

    :param xyz: (B, N, 3) point coordinates.
    :param features: (B, n_in, N, 1) point features.
    :param params: dict of BN-folded conv/linear weights (see __main__).
    :param n_neighbors: K for the self-KNN.
    :param tq: query-tile size (multiple of 128); size against the VMEM budget
               (per-tile temporaries scale with tq * N; 32 MiB limit set below,
               use a smaller tq on v7x for very large N).
    :return: (B, 2*n_out, N, 1) aggregated point features.
    """
    B, n_in, N, _ = features.shape
    C1 = params["w_rpe1"].shape[0]          # n_out // 2
    n_out = 2 * C1
    K = int(n_neighbors)
    if K > N:
        raise ValueError("n_neighbors must be <= number of points")
    assert tq % 128 == 0, "query tile must be a multiple of 128 lanes"

    n_pad = ((N + tq - 1) // tq) * tq
    pad = n_pad - N
    nt = n_pad // tq
    r1 = K * tq

    xyz32 = xyz.astype(jnp.float32)
    feat = features[..., 0].astype(jnp.float32)              # (B, n_in, N)
    if pad:
        # pad coords far away so padded points are never selected as neighbours
        xyz32 = jnp.pad(xyz32, ((0, 0), (0, pad), (0, 0)), constant_values=1.0e6)
        feat = jnp.pad(feat, ((0, 0), (0, 0), (0, pad)))
    xyz_t = jnp.transpose(xyz32, (0, 2, 1))                   # (B, 3, n_pad) lane-dense

    # --- A) mlp1: SharedMLP n_in -> n_out//2, LeakyReLU(0.2), over all points
    feat1 = _pointwise_mlp(feat, params["w1"], params["b1"],
                           negative_slope=0.2, tq=tq)          # (B, C1, n_pad)

    # gather source (support coords + mlp1 features), built once outside the kernel
    gsrc = jnp.concatenate([xyz_t, feat1], axis=1)             # (B, 3+C1, n_pad)

    # --- B) KNN + RPE + mlp_rpe1 + PFA + attentive pooling 1
    pooled1, rpe1, idx = pl.pallas_call(
        _make_knn_agg1_kernel(K, tq, n_pad, C1, n_out),
        out_shape=(jax.ShapeDtypeStruct((B, C1, n_pad), jnp.float32),
                   jax.ShapeDtypeStruct((B, C1, nt * r1), jnp.float32),
                   jax.ShapeDtypeStruct((B, 1, nt * r1), jnp.int32)),
        grid_spec=pltpu.PrefetchScalarGridSpec(
            num_scalar_prefetch=0, grid=(B, nt),
            in_specs=[
                pl.BlockSpec((1, n_pad, 3), lambda b, q: (b, 0, 0)),      # support coords
                pl.BlockSpec((1, 3 + C1, n_pad), lambda b, q: (b, 0, 0)),  # gather source
                pl.BlockSpec((C1, 10), lambda b, q: (0, 0)),
                pl.BlockSpec((C1, 1), lambda b, q: (0, 0)),
                pl.BlockSpec((n_out, n_out), lambda b, q: (0, 0)),
                pl.BlockSpec((C1, n_out), lambda b, q: (0, 0)),
                pl.BlockSpec((C1, 1), lambda b, q: (0, 0)),
            ],
            out_specs=[
                pl.BlockSpec((1, C1, tq), lambda b, q: (b, 0, q)),
                pl.BlockSpec((1, C1, r1), lambda b, q: (b, 0, q)),
                pl.BlockSpec((1, 1, r1), lambda b, q: (b, 0, q)),
            ]),
        compiler_params=pltpu.CompilerParams(
            dimension_semantics=("parallel", "parallel"),
            vmem_limit_bytes=32 * 1024 * 1024),
    )(xyz32, gsrc, params["w_rpe1"], params["b_rpe1"],
      params["ws1"], params["wp1"], params["bp1"])

    # --- C) mlp_rpe2 + PFA(pool-1 output) + attentive pooling 2 + mlp2 + shortcut
    out = pl.pallas_call(
        _make_agg2_kernel(K, tq, n_pad, n_out),
        out_shape=jax.ShapeDtypeStruct((B, 2 * n_out, n_pad), features.dtype),
        grid_spec=pltpu.PrefetchScalarGridSpec(
            num_scalar_prefetch=0, grid=(B, nt),
            in_specs=[
                pl.BlockSpec((1, C1, r1), lambda b, q: (b, 0, q)),
                pl.BlockSpec((1, 1, r1), lambda b, q: (b, 0, q)),
                pl.BlockSpec((1, C1, n_pad), lambda b, q: (b, 0, 0)),      # resident
                pl.BlockSpec((1, n_in, tq), lambda b, q: (b, 0, q)),
                pl.BlockSpec((C1, C1), lambda b, q: (0, 0)),
                pl.BlockSpec((C1, 1), lambda b, q: (0, 0)),
                pl.BlockSpec((n_out, n_out), lambda b, q: (0, 0)),
                pl.BlockSpec((n_out, n_out), lambda b, q: (0, 0)),
                pl.BlockSpec((n_out, 1), lambda b, q: (0, 0)),
                pl.BlockSpec((2 * n_out, n_out), lambda b, q: (0, 0)),
                pl.BlockSpec((2 * n_out, 1), lambda b, q: (0, 0)),
                pl.BlockSpec((2 * n_out, n_in), lambda b, q: (0, 0)),
                pl.BlockSpec((2 * n_out, 1), lambda b, q: (0, 0)),
            ],
            out_specs=pl.BlockSpec((1, 2 * n_out, tq), lambda b, q: (b, 0, q))),
        compiler_params=pltpu.CompilerParams(
            dimension_semantics=("parallel", "parallel"),
            vmem_limit_bytes=32 * 1024 * 1024),
    )(rpe1, idx, pooled1, feat,
      params["w_rpe2"], params["b_rpe2"], params["ws2"], params["wp2"],
      params["bp2"], params["w_mlp2"], params["b_mlp2"],
      params["w_sc"], params["b_sc"])

    return out[:, :, :N, None]


# ---------------------------- pure-JAX reference ----------------------------
def _reference(xyz, features, params, K):
    hp = jax.lax.Precision.HIGHEST
    x = features[..., 0].astype(jnp.float32)                  # (B, n_in, N)
    xyz = xyz.astype(jnp.float32)

    def leaky(v, s):
        return jnp.where(v > 0, v, s * v)

    def pmlp(w, b, v):                                         # (B, C, N) pointwise
        return jnp.einsum("oi,bin->bon", w, v, precision=hp) + b[None]

    def kmlp(w, b, v):                                         # (B, C, N, K)
        return jnp.einsum("oi,bink->bonk", w, v, precision=hp) + b[None, :, :, None]

    # self-KNN
    diff = xyz[:, :, None, :] - xyz[:, None, :, :]
    dist_sq = jnp.sum(diff * diff, axis=-1)
    neg, idx = jax.lax.top_k(-dist_sq, K)                      # (B, N, K)
    dist = jnp.sqrt(jnp.maximum(-neg, 0.0))

    gather = jax.vmap(lambda a, i: a[:, i])                    # (C,N),(N,K)->(C,N,K)

    f1 = leaky(pmlp(params["w1"], params["b1"], x), 0.2)       # mlp1

    xyz_t = jnp.transpose(xyz, (0, 2, 1))
    exp_xyz = jnp.broadcast_to(xyz_t[..., None], xyz_t.shape + (K,))
    nbr_xyz = gather(xyz_t, idx)
    rpe = jnp.concatenate([exp_xyz, nbr_xyz, exp_xyz - nbr_xyz, dist[:, None]], axis=1)
    rpe1 = jax.nn.relu(kmlp(params["w_rpe1"], params["b_rpe1"], rpe))

    fa1 = jnp.concatenate([rpe1, gather(f1, idx)], axis=1)
    s1 = jnp.einsum("oi,bink->bonk", params["ws1"], fa1, precision=hp)
    pooled1 = jnp.sum(jax.nn.softmax(s1, axis=-1) * fa1, axis=-1)
    p1 = jax.nn.relu(pmlp(params["wp1"], params["bp1"], pooled1))

    rpe2 = jax.nn.relu(kmlp(params["w_rpe2"], params["b_rpe2"], rpe1))
    fa2 = jnp.concatenate([rpe2, gather(p1, idx)], axis=1)
    s2 = jnp.einsum("oi,bink->bonk", params["ws2"], fa2, precision=hp)
    pooled2 = jnp.sum(jax.nn.softmax(s2, axis=-1) * fa2, axis=-1)
    p2 = jax.nn.relu(pmlp(params["wp2"], params["bp2"], pooled2))

    y = (pmlp(params["w_mlp2"], params["b_mlp2"], p2)
         + pmlp(params["w_sc"], params["b_sc"], x))
    return leaky(y, 0.01)[..., None]


if __name__ == "__main__":
    import numpy as np

    B, n_in, n_out, K, N = 2, 8, 16, 16, 200
    C1 = n_out // 2

    key = jax.random.PRNGKey(0)
    keys = jax.random.split(key, 20)

    def w(k, shape, fan_in):
        return jax.random.normal(k, shape, jnp.float32) / np.sqrt(fan_in)

    # BatchNorm (eval mode) folded into the conv weights/biases.
    params = {
        "w1": w(keys[0], (C1, n_in), n_in),          "b1": w(keys[1], (C1, 1), 1),
        "w_rpe1": w(keys[2], (C1, 10), 10),          "b_rpe1": w(keys[3], (C1, 1), 1),
        "ws1": w(keys[4], (n_out, n_out), n_out),
        "wp1": w(keys[5], (C1, n_out), n_out),       "bp1": w(keys[6], (C1, 1), 1),
        "w_rpe2": w(keys[7], (C1, C1), C1),          "b_rpe2": w(keys[8], (C1, 1), 1),
        "ws2": w(keys[9], (n_out, n_out), n_out),
        "wp2": w(keys[10], (n_out, n_out), n_out),   "bp2": w(keys[11], (n_out, 1), 1),
        "w_mlp2": w(keys[12], (2 * n_out, n_out), n_out),
        "b_mlp2": w(keys[13], (2 * n_out, 1), 1),
        "w_sc": w(keys[14], (2 * n_out, n_in), n_in),
        "b_sc": w(keys[15], (2 * n_out, 1), 1),
    }

    xyz = jax.random.uniform(keys[16], (B, N, 3), jnp.float32)
    features = jax.random.normal(keys[17], (B, n_in, N, 1), jnp.float32)

    out = local_feature_aggregation(xyz, features, params, n_neighbors=K, tq=128)
    out = jax.block_until_ready(out)
    assert out.shape == (B, 2 * n_out, N, 1)

    ref = _reference(xyz, features, params, K)
    np.testing.assert_allclose(np.asarray(out), np.asarray(ref),
                               rtol=2e-3, atol=2e-3)
    print("KERNEL_OK")
</pallas_src>

<mosaic_0001>
module attributes {stable_mosaic.version = 11 : i64} {
  func.func @kernel(%arg0: i32, %arg1: i32, %arg2: memref<1x8x128xf32, #tpu.memory_space<vmem>>, %arg3: memref<8x8xf32, #tpu.memory_space<vmem>>, %arg4: memref<8x1xf32, #tpu.memory_space<vmem>>, %arg5: memref<1x8x128xf32, #tpu.memory_space<vmem>>) attributes {dimension_semantics = [#tpu.dimension_semantics<parallel>, #tpu.dimension_semantics<parallel>], iteration_bounds = array<i64: 2, 2>, scalar_prefetch = 0 : i64, scratch_operands = 0 : i64, tpu.core_type = #tpu.core_type<tc>, window_params = [{transform_indices = @transform_0, window_bounds = array<i64: 1, 8, 128>}, {pipeline_mode = #tpu.pipeline_mode<synchronous>, transform_indices = @transform_1, window_bounds = array<i64: 8, 8>}, {pipeline_mode = #tpu.pipeline_mode<synchronous>, transform_indices = @transform_2, window_bounds = array<i64: 8, 1>}, {transform_indices = @transform_3, window_bounds = array<i64: 1, 8, 128>}]} {
    %c0 = arith.constant 0 : index
    %c0_0 = arith.constant 0 : index
    %0 = vector.load %arg3[%c0, %c0_0] : memref<8x8xf32, #tpu.memory_space<vmem>>, vector<8x8xf32>
    %c0_1 = arith.constant 0 : index
    %c0_2 = arith.constant 0 : index
    %c0_3 = arith.constant 0 : index
    %1 = vector.load %arg2[%c0_1, %c0_2, %c0_3] : memref<1x8x128xf32, #tpu.memory_space<vmem>>, vector<1x8x128xf32>
    %2 = vector.shape_cast %1 : vector<1x8x128xf32> to vector<8x128xf32>
    %cst = arith.constant dense<0.000000e+00> : vector<8x128xf32>
    %3 = tpu.matmul %0, %2, %cst {dimension_numbers = #tpu.dot_dimension_numbers<[1], [0], [0], [1], [0, 0, 1, 1], [], []>} : vector<8x8xf32>, vector<8x128xf32>, vector<8x128xf32> -> vector<8x128xf32>
    %c0_4 = arith.constant 0 : index
    %c0_5 = arith.constant 0 : index
    %4 = vector.load %arg4[%c0_4, %c0_5] : memref<8x1xf32, #tpu.memory_space<vmem>>, vector<8x1xf32>
    %5 = vector.broadcast %4 : vector<8x1xf32> to vector<8x128xf32>
    %6 = arith.addf %3, %5 : vector<8x128xf32>
    %cst_6 = arith.constant 0.000000e+00 : f32
    %7 = vector.broadcast %cst_6 : f32 to vector<8x128xf32>
    %8 = arith.cmpf ogt, %6, %7 : vector<8x128xf32>
    %cst_7 = arith.constant 2.000000e-01 : f32
    %9 = vector.broadcast %cst_7 : f32 to vector<8x128xf32>
    %10 = arith.mulf %9, %6 : vector<8x128xf32>
    %11 = arith.select %8, %6, %10 : vector<8x128xi1>, vector<8x128xf32>
    %c0_8 = arith.constant 0 : index
    %c0_9 = arith.constant 0 : index
    %c0_10 = arith.constant 0 : index
    %12 = vector.load %arg5[%c0_8, %c0_9, %c0_10] : memref<1x8x128xf32, #tpu.memory_space<vmem>>, vector<1x8x128xf32>
    %13 = vector.shape_cast %12 : vector<1x8x128xf32> to vector<8x128xf32>
    %14 = vector.shape_cast %11 : vector<8x128xf32> to vector<1x8x128xf32>
    tpu.vector_store %arg5[%c0_8, %c0_9, %c0_10], %14 {strides = array<i32>} : memref<1x8x128xf32, #tpu.memory_space<vmem>>, vector<1x8x128xf32>,
    return
  }
  func.func @transform_0(%arg0: i32, %arg1: i32) -> (i32, i32, i32) {
    %c0_i32 = arith.constant 0 : i32
    %c0_i32_0 = arith.constant 0 : i32
    return %arg0, %c0_i32, %arg1 : i32, i32, i32
  }
  func.func @transform_1(%arg0: i32, %arg1: i32) -> (i32, i32) {
    %c0_i32 = arith.constant 0 : i32
    %c0_i32_0 = arith.constant 0 : i32
    %c0_i32_1 = arith.constant 0 : i32
    return %c0_i32, %c0_i32_0 : i32, i32
  }
  func.func @transform_2(%arg0: i32, %arg1: i32) -> (i32, i32) {
    %c0_i32 = arith.constant 0 : i32
    %c0_i32_0 = arith.constant 0 : i32
    %c0_i32_1 = arith.constant 0 : i32
    return %c0_i32, %c0_i32_0 : i32, i32
  }
  func.func @transform_3(%arg0: i32, %arg1: i32) -> (i32, i32, i32) {
    %c0_i32 = arith.constant 0 : i32
    %c0_i32_0 = arith.constant 0 : i32
    return %arg0, %c0_i32, %arg1 : i32, i32, i32
  }
}

</mosaic_0001>

<bundles_post_ra>
// kernel: tpu_custom_call.1
= control target key start
LH: loop header
LB: loop body
LE: loop exit
PB: predicated region body
PF: predicated region fallthrough
CT: control target
= control target key end

     0   :  { %8 = vsyncpa [#allocation3], 0  ;;  %s851_s0 = inlined_call_operand.hbm [shape: f32[2,8,256], index: 0, kind: input, shape index: {}]   ;;  %s852_s1 = inlined_call_operand.vmem [shape: f32[8,8], index: 1, kind: input, shape index: {}]   ;;  %s853_s2 = inlined_call_operand.vmem [shape: f32[8,1], index: 2, kind: input, shape index: {}]   ;;  %s854_s3 = inlined_call_operand.hbm [shape: f32[2,8,256], index: 3, kind: output, shape index: {}]  }
   0x1   :  { %10 = vsyncpa [#allocation3 + $0x1], 0 }
   0x2   :  { %11 = vsyncpa [#allocation4], 0 }
   0x3   :  { %13 = vsyncpa [#allocation4 + $0x1], 0  ;;  %s651_s12 = smov 0   ;;  %s653_s13 = smov 0  }
   0x4   :  { %s655_s14 = smov 0   ;;  %s657_s15 = smov 0  }
   0x5   :  { %s659_s16 = smov 0   ;;  %s661_s17 = smov 0  }
   0x6   :  { %s663_s18 = smov 0   ;;  %s665_s19 = smov 0  }
   0x7 LB: > { %s391_s20 = sadd.s32 4294967295, %s624_s19   ;;  %s392_s21 = sadd.s32 4294967294, %s624_s19   ;;  %s624_s19 = sphi %s665_s19, %s19_s19   ;;  %s620_s18 = sphi %s663_s18, %s871_s18   ;;  %s616_s17 = sphi %s661_s17, %s870_s17   ;;  %s612_s16 = sphi %s659_s16, %s869_s16   ;;  %s608_s15 = sphi %s657_s15, %s868_s15   ;;  %s604_s14 = sphi %s655_s14, %s867_s14   ;;  %s600_s13 = sphi %s653_s13, %s866_s13   ;;  %s596_s12 = sphi %s651_s12, %s865_s12  }
   0x8   : > { %s28_s22 = sadd.s32 1, %s616_s17  ;;  %s31_s23 = sadd.s32 1, %s620_s18 }
   0x9   : > { %p29_p0 = scmp.ge.s32.totalorder %s28_s22, 2  ;;  %s40_s24 = sadd.s32 1, %s604_s14 }
   0xa   : > { %p47_p1 = scmp.ne.s32.totalorder %s604_s14, %s600_s13  ;;  %p48_p2 = scmp.eq.s32.totalorder %s624_s19, 0 }
   0xb   : > { %s873_s22 = smov (%p29_p0, %s28_s22), 0  ;;  %s875_s23 = smov (!%p29_p0, %s31_s23), %s620_s18 }
   0xc   : > { %s36_s25 = ssub.s32 %s616_s17, %s873_s22  ;;  %p704_p3 = por %p48_p2, %p47_p1 }
   0xd   : > { %p33_p4 = scmp.ge.s32.totalorder %s875_s23, 2  ;;  %p53_p5 = scmp.ne.s32.totalorder %s600_s13, %s596_s12 }
   0xe   : > { %p54_p6 = scmp.eq.s32.totalorder %s391_s20, 0  ;;  %p121_p7 = scmp.eq.s32.totalorder %s391_s20, 3 }
   0xf   : > { %s877_s23 = smov (%p33_p4, %s875_s23), 0  ;;  %p127_p10 = scmp.eq.s32.totalorder %s392_s21, 3 }
  0x10   : > { %p712_p8 = por %p54_p6, %p53_p5  ;;  %p716_p9 = por %p121_p7, %p47_p1 }
  0x11   : > { %s35_s29 = ssub.s32 %s620_s18, %s877_s23  ;;  %p722_p12 = por %p127_p10, %p53_p5 }
  0x12   : > { %s858_s28 = scalar_select %p716_p9, 1, 0 }
  0x13   : > { %s37_s30 = sor.u32 %s36_s25, %s35_s29  ;;  %p426_p13 = scmp.lt.s32.totalorder %s624_s19, 4 }
  0x14   : > { %p38_p11 = scmp.eq.s32.totalorder %s37_s30, 0  ;;  %s153_s5 = sand.u32 1, %s604_s14  }
  0x15   : > { %s859_s4 = scalar_select %p722_p12, 1, 0 }
  0x16   : > { %s729_s6 = scalar_select %p38_p11, %s604_s14, %s40_s24  }
  0x17   : > { %s395_s7 = sshll.u32 %s153_s5, 3  ;;  %s396_s8 = sshll.u32 %s620_s18, 1 }
  0x18   : > { %s162_s9 = sadd.s32 %s616_s17, %s396_s8  ;;  %s157_s10 = scalar_lea.vmem [#allocation2], %s395_s7 }
  0x19   : > { %s166_s11 = sshll.u32 %s157_s10, 4  ;;  %s397_s20 = sshll.u32 %s162_s9, 7  ;;  %s733_s11 = int_to_ptr.vmem [resolvable:$true] %s166_s11 }
  0x1a   : > { %s738_s29 = scalar_lea.hbm %s851_s0, %s397_s20  ;;  %p742_p0 = pnand %p426_p13, %p704_p3 }
  0x1b   : > { %s154_s30 = scalar_lea.sflag [#allocation3], %s153_s5  ;;  %s496_s7 = scalar_lea.hbm %s738_s29, 128 }
  0x1c   : > { %p497_p4 = scmp.ne.s32.totalorder %s738_s29, %s496_s7  ;;  %p498_p5 = pneg %p742_p0 }
  0x1d   : > { %s501_s9 = scalar_lea.hbm %s851_s0, 512  ;;  %p502_p3 = scmp.lt.u32.totalorder %s738_s29, %s851_s0 }
  0x1e   : > { %p499_p6 = pnand %p498_p5, %p497_p4  ;;  %p503_p10 = scmp.lt.u32.totalorder %s501_s9, %s496_s7 }
  0x1f   : > { %p505_p13 = scmp.lt.u32.totalorder %s496_s7, %s738_s29 }
  0x20   : > { %p500_p7 = pneg %p499_p6  ;;  %p504_p11 = por %p503_p10, %p502_p3 }
  0x22   : > { %p506_p1 = por %p505_p13, %p504_p11 }
  0x24   : > { %p507_p2 = pnand %p506_p1, %p500_p7 }
  0x26   : > { %510 = shalt.err (!%p507_p2)
}
  0x27   : > { %s511_s5 = scalar_lea.vmem %s733_s11, 128  ;;  %s626_s21 = smov [#allocation2]  }
  0x28   : > { %p512_p4 = scmp.ne.s32.totalorder %s733_s11, %s511_s5  ;;  %s516_s25 = sshll.u32 %s626_s21, 4  ;;  %s517_s25 = int_to_ptr.vmem [resolvable:$false] %s516_s25 }
  0x29   : > { %s518_s26 = scalar_lea.vmem %s517_s25, 256  ;;  %p519_p9 = scmp.lt.s32.totalorder %s733_s11, %s517_s25 }
  0x2a   : > { %p514_p6 = pnand %p512_p4, %p498_p5  ;;  %p520_p3 = scmp.lt.s32.totalorder %s518_s26, %s511_s5 }
  0x2c   : > { %p515_p12 = pneg %p514_p6  ;;  %p521_p10 = por %p520_p3, %p519_p9 }
  0x2e   : > { %p522_p11 = pnand %p521_p10, %p515_p12 }
  0x30   : > { %525 = shalt.err (!%p522_p11)
}
  0x31   : > { %421 = dma.hbm_to_vmem [thread:$0]  (!%p742_p0), %s738_s29, 128, %s733_s11, %s154_s30  }
  0x32   : > { %p861_p1 = scmp.lt.s32.totalorder %s624_s19, 5  ;;  %p862_p2 = scmp.ge.s32.totalorder %s624_s19, 1 }
  0x34   : > { %p172_p5 = pnand %p862_p2, %p861_p1 }
  0x35   : > { %s778_s7 = sand.u32 (!%p172_p5), 1, %s600_s13  }
  0x36   : > { %175 = sbr.rel (%p172_p5) target bundleno = 296 (0x128), region = 32  ;;  %s399_s8 = sshll.u32 (!%p172_p5), %s778_s7, 3 }
  0x37   : > { %s178_s9 = scalar_lea.sflag (!%p172_p5), [#allocation3], %s778_s7  ;;  %s181_s10 = scalar_lea.vmem (!%p172_p5), [#allocation2], %s399_s8 }
  0x3d   : > { %587 = dma.done.wait (%p712_p8), %s178_s9, 128  }
  0x3e   : > { %589 = vsyncadd (%p712_p8), %s178_s9, 4294967168  ;;  %v627_v0 = vmov 0.0   ;;  %vm628_vm0 = vmmov 0   ;;  %v629_v1 = vmov 0   ;;  %vm212_vm1 = vcmask 64512   ;;  %v205_v2 = vld [vmem:[%s181_s10] sm:$0xff] }
  0x3f   : > { %409 = vmatprep.subr.mxu0 %v627_v0  ;;  %411 = vmatprep.mubr.msk.f32.mxu0 %vm628_vm0, %v627_v0  ;;  %v204_v3 = vld [vmem:[%s852_s1] sm:$0xff]  ;;  %s403_s27 = sshll.u32 %s612_s16, 1  ;;  %s203_s21 = scalar_lea.vmem [#allocation5], %s399_s8 }
  0x40   : > { %495 = vset.pattern.permute.xlu0 %v629_v1  ;;  %v206_v4 = vld [vmem:[%s853_s2] sm:$0xff]  ;;  %410 = vmatpush3.msra.mxu0 %v205_v2  ;;  %s302_s20 = sadd.s32 %s608_s15, %s403_s27  ;;  %s306_s25 = sshll.u32 %s203_s21, 4  ;;  %s799_s25 = int_to_ptr.vmem [resolvable:$true] %s306_s25 }
  0x41   : > { %209 = vperm.xlu0 %495, %v206_v4   ;;  %412 = vmatmul.mubr.msk.f32.vlgmr.msra.gmra.mrb[0].mxu0 %vm212_vm1, %v204_v3  ;;  %s404_s5 = sshll.u32 %s302_s20, 7  ;;  %s291_s15 = scalar_lea.sflag [#allocation4], %s778_s7 }
  0x42   : > { %s797_s10 = scalar_lea.hbm %s854_s3, %s404_s5  ;;  %s526_s16 = scalar_lea.vmem %s799_s25, 128 }
  0x43   : > { %p527_p8 = scmp.ne.s32.totalorder %s799_s25, %s526_s16  ;;  %p863_p9 = scmp.ne.s32.totalorder %s858_s28, 0 }
  0x44   : > { %s630_s8 = smov [#allocation5]  }
  0x45   : > { %p528_p12 = pnand %p527_p8, %p863_p9  ;;  %s530_s11 = sshll.u32 %s630_s8, 4  ;;  %s531_s11 = int_to_ptr.vmem [resolvable:$false] %s530_s11 }
  0x46   : > { %s532_s29 = scalar_lea.vmem %s531_s11, 256  ;;  %p533_p7 = scmp.lt.s32.totalorder %s799_s25, %s531_s11 }
  0x47   : > { %p529_p0 = pneg %p528_p12  ;;  %p534_p13 = scmp.lt.s32.totalorder %s532_s29, %s526_s16 }
  0x49   : > { %p535_p4 = por %p534_p13, %p533_p7 }
  0x4b   : > { %p536_p6 = pnand %p535_p4, %p529_p0 }
  0xc0   : > { %v210_v5 = vpop.permute.xlu0 %209 }
 0x114   : > { %v282_v6 = vpop.f32.mrb[0].mxu0 }
 0x115   : > { %v283_v7 = vadd.f32 %v282_v6, %v210_v5  ;;  %v413_v8 = vpop.f32.mrb[1].mxu0 }
 0x117   : > { %vm286_vm2 = vcmp.gt.f32.partialorder %v283_v7, 0.0  ;;  %v287_v9 = vmul.f32 0.2, %v283_v7 }
 0x119   : > { %v288_v10 = vsel %vm286_vm2, %v283_v7, %v287_v9 }
 0x11a   : > { %289 = vst [vmem:[%s203_s21] sm:$0xff] %v288_v10 }
 0x11b   : > { %539 = shalt.err (!%p536_p6)
}
 0x11c   : > { %s540_s7 = scalar_lea.hbm %s797_s10, 128  ;;  %s544_s27 = scalar_lea.hbm %s854_s3, 512 }
 0x11d   : > { %p541_p3 = scmp.ne.s32.totalorder %s797_s10, %s540_s7  ;;  %p545_p1 = scmp.lt.u32.totalorder %s797_s10, %s854_s3 }
 0x11e   : > { %p546_p2 = scmp.lt.u32.totalorder %s544_s27, %s540_s7  ;;  %p548_p8 = scmp.lt.u32.totalorder %s540_s7, %s797_s10 }
 0x11f   : > { %p542_p10 = pnand %p541_p3, %p863_p9 }
 0x120   : > { %p547_p5 = por %p546_p2, %p545_p1 }
 0x121   : > { %p543_p11 = pneg %p542_p10 }
 0x122   : > { %p549_p12 = por %p548_p8, %p547_p5 }
 0x124   : > { %p550_p0 = pnand %p549_p12, %p543_p11 }
 0x126   : > { %553 = shalt.err (!%p550_p0)
}
 0x127   : > { %416 = dma.vmem_to_hbm [thread:$0]  (%p863_p9), %s799_s25, 128, %s797_s10, %s291_s15  }
 0x128 PF: > { %p427_p7 = scmp.ge.s32.totalorder %s624_s19, 2  ;;  %s318_s21 = sand.u32 1, %s596_s12  }
 0x129   : > { %p864_p13 = scmp.ne.s32.totalorder %s859_s4, 0  ;;  %s319_s26 = scalar_lea.sflag [#allocation4], %s318_s21 }
 0x12b   : > { %p423_p4 = pnand %p427_p7, %p864_p13 }
 0x12d   : > { %591 = dma.done.wait (!%p423_p4), %s319_s26, 128  }
 0x12e   : > { %593 = vsyncadd (!%p423_p4), %s319_s26, 4294967168  ;;  %s19_s19 = sadd.s32 1, %s624_s19   ;;  %s865_s12 = smov %s600_s13 }
 0x12f   : > { %p16_p6 = scmp.ge.s32.totalorder %s19_s19, 6   ;;  %s866_s13 = smov %s604_s14 }
 0x130   : > { %s867_s14 = smov %s729_s6  ;;  %s868_s15 = smov %s616_s17 }
 0x131   : > { %s869_s16 = smov %s620_s18  ;;  %s870_s17 = smov %s873_s22 }
 0x132   : > { %s871_s18 = smov %s877_s23  ;;  %18 = sbr.rel (!%p16_p6) target bundleno = 7 (0x7), region = 77 }
 0x139   :  { %324 = vsyncpa [#allocation3], 1 }
 0x13a   :  { %326 = vsyncpa [#allocation3 + $0x1], 1 }
 0x13b   :  { %327 = vsyncpa [#allocation4], 1 }
 0x13c   :  { %329 = vsyncpa [#allocation4 + $0x1], 1 }

</bundles_post_ra>
